<compile_context>
chip_gen: v5e
topology: v5e:2x2
jax: 0.10.0
libtpu: 0.0.40
codegen_flags: <defaults>
</compile_context>

<pallas_src>
from typing import Any, Callable

import jax
import jax.numpy as jnp
from jax.experimental import pallas as pl
from jax.experimental.pallas import tpu as pltpu

_LANE = 128


# ----------------------------- Pallas kernel ------------------------------

def _gelu_kernel(x_ref, o_ref):
    # Elementwise tanh-approx GELU, computed entirely in VMEM on the VPU/EUP.
    x = x_ref[...].astype(jnp.float32)          # no-op for f32 inputs
    c = jnp.float32(0.7978845608028654)         # sqrt(2/pi)
    a = jnp.float32(0.044715)
    one = jnp.float32(1.0)
    half = jnp.float32(0.5)
    x2 = x * x
    inner = c * x * (one + a * x2)              # fewer multiplies than x + a*x^3
    y = half * x * (one + jnp.tanh(inner))      # tanh -> EUP slot
    o_ref[...] = y.astype(o_ref.dtype)


# ------------------------------ host wrapper -------------------------------

def _round_up(v: int, m: int) -> int:
    return ((v + m - 1) // m) * m


def _sublane_pack(dtype) -> int:
    # Native sublane packing: 8 for 32-bit, 16 for bf16/f16, 32 for 8-bit.
    itemsize = jnp.dtype(dtype).itemsize
    return max(8, 32 // max(1, itemsize))


def pallas_gelu(x: jax.Array) -> jax.Array:
    """Elementwise GELU on an arbitrarily-shaped array via a Pallas TPU kernel."""
    orig_shape = x.shape
    orig_dtype = x.dtype
    n = x.size
    if n == 0:
        return x

    itemsize = jnp.dtype(orig_dtype).itemsize
    pack = _sublane_pack(orig_dtype)

    # Flatten to a lane-dense 2D slab. Zero-copy reshape when n % 128 == 0;
    # otherwise pad only the final partial lane row (<= 127 elements).
    x_flat = jnp.ravel(x)
    n_lane = _round_up(n, _LANE)
    padded = n_lane != n
    if padded:
        x_flat = jnp.pad(x_flat, (0, n_lane - n))
    rows = n_lane // _LANE
    x2d = x_flat.reshape(rows, _LANE)

    # Block rows from a VMEM byte budget (~2 MiB per block). Double-buffered
    # in+out -> ~8 MiB total: fits v5e's 16 MiB scoped-VMEM default and leaves
    # ample headroom on v6e (32 MiB default) / v7x (32 MiB default, 64 MiB TC).
    target_block_bytes = 2 * 1024 * 1024
    max_rows = max(pack, target_block_bytes // (_LANE * itemsize))
    max_rows = _round_up(max_rows, pack)
    row_block = min(rows, max_rows)

    # On large inputs, make sure the "parallel" grid has >= 2 steps so both
    # v7x TensorCores can stream from HBM concurrently.
    if rows >= 1024 and row_block == rows:
        row_block = _round_up(pl.cdiv(rows, 2), pack)

    # Block shape must be (8,128)-divisible or equal the full array dims.
    if row_block != rows:
        row_block = _round_up(row_block, pack)

    grid = (pl.cdiv(rows, row_block),)   # ragged last block handled by Pallas

    out2d = pl.pallas_call(
        _gelu_kernel,
        out_shape=jax.ShapeDtypeStruct((rows, _LANE), orig_dtype),
        grid_spec=pltpu.PrefetchScalarGridSpec(
            num_scalar_prefetch=0,
            grid=grid,
            in_specs=[pl.BlockSpec((row_block, _LANE), lambda i: (i, 0))],
            out_specs=pl.BlockSpec((row_block, _LANE), lambda i: (i, 0)),
        ),
        compiler_params=pltpu.CompilerParams(
            dimension_semantics=("parallel",),
        ),
    )(x2d)

    out_flat = out2d.reshape(-1)
    if padded:
        out_flat = out_flat[:n]
    return out_flat.reshape(orig_shape)


# ------------------------------ Lambda module ------------------------------

class Lambda:
    """JAX port of refiners' Lambda: wraps a callable so it acts as a module.

    forward(*args) == self.func(*args) — no parameters, no state.
    """

    def __init__(self, func: Callable[..., Any]) -> None:
        self.func = func

    def __call__(self, *args: Any) -> Any:
        return self.forward(*args)

    def forward(self, *args: Any) -> Any:
        return self.func(*args)

    def __str__(self) -> str:
        func_name = getattr(self.func, "__name__", "partial_function")
        return f"Lambda({func_name})"


# --------------------------------- main ------------------------------------

def _ref_gelu(x):
    c = 0.7978845608028654
    return 0.5 * x * (1.0 + jnp.tanh(c * (x + 0.044715 * x**3)))


if __name__ == "__main__":
    key = jax.random.PRNGKey(0)
    lam = Lambda(pallas_gelu)

    # Small NCHW input consistent with typical usage of the wrapped callable.
    x = jax.random.normal(key, (2, 4, 16, 16), dtype=jnp.float32)
    y = jax.block_until_ready(lam(x))
    assert y.shape == x.shape and y.dtype == x.dtype
    assert jnp.max(jnp.abs(y - _ref_gelu(x))) < 1e-5

    # Exercise the non-128-multiple (ragged / padded-lane-row) path too.
    x2 = jax.random.normal(jax.random.PRNGKey(1), (3, 5, 7, 11), dtype=jnp.float32)
    y2 = jax.block_until_ready(lam(x2))
    assert y2.shape == x2.shape and y2.dtype == x2.dtype
    assert jnp.max(jnp.abs(y2 - _ref_gelu(x2))) < 1e-5

    print("KERNEL_OK")
</pallas_src>

<mosaic_0001>
module attributes {stable_mosaic.version = 11 : i64} {
  func.func @_gelu_kernel(%arg0: i32, %arg1: memref<16x128xf32, #tpu.memory_space<vmem>>, %arg2: memref<16x128xf32, #tpu.memory_space<vmem>>) attributes {dimension_semantics = [#tpu.dimension_semantics<parallel>], iteration_bounds = array<i64: 1>, scalar_prefetch = 0 : i64, scratch_operands = 0 : i64, tpu.core_type = #tpu.core_type<tc>, window_params = [{transform_indices = @transform_0, window_bounds = array<i64: 16, 128>}, {transform_indices = @transform_1, window_bounds = array<i64: 16, 128>}]} {
    %c0 = arith.constant 0 : index
    %c0_0 = arith.constant 0 : index
    %0 = vector.load %arg1[%c0, %c0_0] : memref<16x128xf32, #tpu.memory_space<vmem>>, vector<16x128xf32>
    %1 = arith.mulf %0, %0 : vector<16x128xf32>
    %cst = arith.constant 0.797884583 : f32
    %2 = vector.broadcast %cst : f32 to vector<16x128xf32>
    %3 = arith.mulf %2, %0 : vector<16x128xf32>
    %cst_1 = arith.constant 4.471500e-02 : f32
    %4 = vector.broadcast %cst_1 : f32 to vector<16x128xf32>
    %5 = arith.mulf %4, %1 : vector<16x128xf32>
    %cst_2 = arith.constant 1.000000e+00 : f32
    %6 = vector.broadcast %cst_2 : f32 to vector<16x128xf32>
    %7 = arith.addf %6, %5 : vector<16x128xf32>
    %8 = arith.mulf %3, %7 : vector<16x128xf32>
    %cst_3 = arith.constant 5.000000e-01 : f32
    %9 = vector.broadcast %cst_3 : f32 to vector<16x128xf32>
    %10 = arith.mulf %9, %0 : vector<16x128xf32>
    %11 = math.tanh %8 : vector<16x128xf32>
    %cst_4 = arith.constant 1.000000e+00 : f32
    %12 = vector.broadcast %cst_4 : f32 to vector<16x128xf32>
    %13 = arith.addf %12, %11 : vector<16x128xf32>
    %14 = arith.mulf %10, %13 : vector<16x128xf32>
    %c0_5 = arith.constant 0 : index
    %c0_6 = arith.constant 0 : index
    %15 = vector.load %arg2[%c0_5, %c0_6] : memref<16x128xf32, #tpu.memory_space<vmem>>, vector<16x128xf32>
    tpu.vector_store %arg2[%c0_5, %c0_6], %14 {strides = array<i32>} : memref<16x128xf32, #tpu.memory_space<vmem>>, vector<16x128xf32>,
    return
  }
  func.func @transform_0(%arg0: i32) -> (i32, i32) {
    %c0_i32 = arith.constant 0 : i32
    %c0_i32_0 = arith.constant 0 : i32
    return %arg0, %c0_i32 : i32, i32
  }
  func.func @transform_1(%arg0: i32) -> (i32, i32) {
    %c0_i32 = arith.constant 0 : i32
    %c0_i32_0 = arith.constant 0 : i32
    return %arg0, %c0_i32 : i32, i32
  }
}

</mosaic_0001>

<bundles_post_ra>
// kernel: tpu_custom_call.1
= control target key start
LH: loop header
LB: loop body
LE: loop exit
PB: predicated region body
PF: predicated region fallthrough
CT: control target
= control target key end

     0   :  { %6 = vsyncpa [#allocation3], 0  ;;  %s152_s0 = inlined_call_operand.hbm [shape: f32[16,128], index: 0, kind: input, shape index: {}]   ;;  %s153_s1 = inlined_call_operand.hbm [shape: f32[16,128], index: 1, kind: output, shape index: {}]  }
   0x1   :  { %7 = vsyncpa [#allocation4], 0  ;;  %s12_s8 = sshll.u32 %s152_s0, 4  ;;  %s126_s9 = smov [#allocation2]   ;;  %s13_s8 = int_to_ptr.hbm [resolvable:$true] %s12_s8 }
   0x2   :  { %s14_s10 = sshll.u32 %s126_s9, 4  ;;  %s127_s11 = smov 128   ;;  %s15_s10 = int_to_ptr.vmem [resolvable:$true] %s14_s10 }
   0x3   :  { %s128_s12 = smov 8  }
   0x4   :  { %20 = dma.hbm_to_vmem [thread:$0]  %s13_s8, 256, %s15_s10, [#allocation3], %s127_s11, %s127_s11, %s128_s12  }
   0x5   :  { %122 = dma.done.wait [#allocation3], 256  }
   0x6   :  { %123 = vsyncadd [#allocation3], 4294967040  ;;  %v25_v0 = vld [vmem:[#allocation2] sm:$0xff]  ;;  %v26_v1 = vld [vmem:[#allocation2 + $0x8] sm:$0xff]  ;;  %s129_s0 = smov [#allocation5]   ;;  %s53_s16 = sshll.u32 %s153_s1, 4  ;;  %s54_s16 = int_to_ptr.hbm [resolvable:$true] %s53_s16 }
   0x7   :  { %v27_v2 = vmul.f32 %v25_v0, %v25_v0  ;;  %v28_v3 = vmul.f32 %v26_v1, %v26_v1  ;;  %v29_v4 = vmul.f32 0.7978846, %v25_v0  ;;  %v30_v6 = vmul.f32 0.7978846, %v26_v1  ;;  %s51_s13 = sshll.u32 %s129_s0, 4  ;;  %s52_s13 = int_to_ptr.vmem [resolvable:$true] %s51_s13 }
   0x8   :  { %v37_v12 = vmul.f32 0.5, %v25_v0  ;;  %v38_v14 = vmul.f32 0.5, %v26_v1 }
   0x9   :  { %v31_v5 = vmul.f32 0.044715, %v27_v2  ;;  %v32_v7 = vmul.f32 0.044715, %v28_v3 }
   0xb   :  { %v33_v8 = vadd.f32 1.0, %v31_v5  ;;  %v34_v9 = vadd.f32 1.0, %v32_v7 }
   0xd   :  { %v35_v10 = vmul.f32 %v33_v8, %v29_v4  ;;  %v36_v11 = vmul.f32 %v34_v9, %v30_v6 }
   0xf   :  { %70 = vtanh.f32 %v35_v10 }
  0x10   :  { %72 = vtanh.f32 %v36_v11 }
  0x15   :  { %v71_v13 = vpop.eup %70 }
  0x16   :  { %v73_v15 = vpop.eup %72  ;;  %v41_v16 = vadd.f32 1.0, %v71_v13 }
  0x17   :  { %v42_v17 = vadd.f32 1.0, %v73_v15 }
  0x18   :  { %v43_v18 = vmul.f32 %v41_v16, %v37_v12 }
  0x19   :  { %v44_v19 = vmul.f32 %v42_v17, %v38_v14 }
  0x1a   :  { %45 = vst [vmem:[#allocation5] sm:$0xff] %v43_v18 }
  0x1b   :  { %46 = vst [vmem:[#allocation5 + $0x8] sm:$0xff] %v44_v19 }
  0x1c   :  { %59 = dma.vmem_to_hbm [thread:$0]  %s52_s13, 256, %s54_s16, [#allocation4], %s127_s11, %s127_s11, %s128_s12  }
  0x1d   :  { %124 = dma.done.wait [#allocation4], 256  }
  0x1e   :  { %125 = vsyncadd [#allocation4], 4294967040 }
  0x1f   :  { %64 = vsyncpa [#allocation3], 1 }
  0x20   :  { %65 = vsyncpa [#allocation4], 1 }

</bundles_post_ra>
